<compile_context>
chip_gen: v6e
topology: v6e:2x2x1
jax: 0.10.0
libtpu: 0.0.40
codegen_flags: <defaults>
</compile_context>

<pallas_src>
import functools

import jax
import jax.numpy as jnp
from jax.experimental import pallas as pl
from jax.experimental.pallas import tpu as pltpu


def _round_up(x, m):
    return (x + m - 1) // m * m


def _self_output_kernel(x_ref, res_ref, w_ref, p_ref, o_ref, *, eps):
    # x_ref:   (TM, Ph) hidden_states row tile (native / matmul dtype)
    # res_ref: (TM, H)  residual row tile
    # w_ref:   (Ph, H)  dense weight, already transposed to x @ W form
    # p_ref:   (3, H)   f32 rows: [dense_b; ln_gamma; ln_beta]
    # o_ref:   (TM, H)  output tile

    # MXU matmul in native dtype with f32 accumulation.
    y = jnp.dot(x_ref[...], w_ref[...], preferred_element_type=jnp.float32)

    # TODO(synk): dropout is identity in eval mode; training-time dropout not implemented.

    # Bias + residual in f32 (VPU).
    y = y + p_ref[0:1, :] + res_ref[...].astype(jnp.float32)

    # Centered LayerNorm over the hidden axis.  The block width equals the true
    # hidden size (no lane padding), so full-axis sums are exact.
    h = y.shape[-1]
    inv_h = 1.0 / h
    mean = jnp.sum(y, axis=-1, keepdims=True) * inv_h
    yc = y - mean
    var = jnp.sum(yc * yc, axis=-1, keepdims=True) * inv_h
    out = yc * jax.lax.rsqrt(var + eps) * p_ref[1:2, :] + p_ref[2:3, :]

    o_ref[...] = out.astype(o_ref.dtype)


def costeff_self_output(hidden_states, input_tensor, params, *, eps=1e-12,
                        row_tile=512, matmul_dtype=None):
    """hidden_states: [B, S, Ph], input_tensor: [B, S, H] -> [B, S, H]."""
    B, S, Ph = hidden_states.shape
    H = input_tensor.shape[-1]
    N = B * S
    out_dtype = input_tensor.dtype

    # Flat row views (free reshapes, no HBM copy).
    x2 = hidden_states.reshape(N, Ph)
    r2 = input_tensor.reshape(N, H)

    # Optional low-precision MXU operands (mainly a win on v5e for f32 inputs).
    if matmul_dtype is not None:
        x2 = x2.astype(matmul_dtype)
    mm_dtype = x2.dtype
    # PyTorch nn.Linear stores weight as (out, in); present it as (in, out).
    w_t = params["dense_w"].T.astype(mm_dtype)                       # (Ph, H)
    # Pack bias / LN gamma / LN beta into a single f32 operand.
    pvec = jnp.stack([params["dense_b"], params["ln_w"], params["ln_b"]],
                     axis=0).astype(jnp.float32)                     # (3, H)

    # Row tile: large (amortizes ~0.35us/step pipeline overhead), aligned to the
    # sublane pack, clamped to the problem, and split so the row grid has at
    # least 2 steps when N allows (so both v7x TensorCores get work).
    sub = 16 if mm_dtype == jnp.bfloat16 else 8
    tm = _round_up(max(sub, min(row_tile, _round_up(N, sub))), sub)
    if pl.cdiv(N, tm) < 2 and N > sub:
        tm = _round_up(pl.cdiv(N, 2), sub)
    grid = (pl.cdiv(N, tm),)

    item_x = jnp.dtype(mm_dtype).itemsize
    item_r = jnp.dtype(input_tensor.dtype).itemsize
    item_o = jnp.dtype(out_dtype).itemsize

    # VMEM budget (conservative: assumes double-buffered weight).
    vmem_need = (2 * tm * Ph * item_x            # x tiles (double-buffered)
                 + 2 * tm * H * item_r           # residual tiles
                 + 2 * tm * H * item_o           # output tiles
                 + 2 * Ph * H * item_x           # resident weight
                 + 2 * 3 * H * 4                 # packed params
                 + tm * H * 4)                   # f32 intermediate y
    # TODO(synk): if the resident weight alone approaches the VMEM budget (very
    # large hidden sizes on v7x), K-tile the matmul with an f32 accumulator.
    try:
        vmem_phys = pltpu.get_tpu_info().vmem_capacity_bytes
    except Exception:
        vmem_phys = 64 << 20          # conservative: v7x per-TensorCore VMEM
    vmem_cap = int(vmem_phys * 0.8)   # leave headroom for Mosaic internal scratch
    vmem_limit = int(min(max(int(1.5 * vmem_need), 16 << 20), vmem_cap))

    cost = pl.CostEstimate(
        flops=2 * N * Ph * H,
        transcendentals=N,
        bytes_accessed=(N * Ph * item_x + N * H * item_r + N * H * item_o
                        + Ph * H * item_x + 3 * H * 4),
    )

    def _build(use_buffered):
        def _const_spec(shape):
            if use_buffered:
                # Grid-invariant operand: no need for a second pipeline buffer.
                return pl.BlockSpec(shape, lambda i: (0, 0),
                                    pipeline_mode=pl.Buffered(1))
            return pl.BlockSpec(shape, lambda i: (0, 0))

        return pl.pallas_call(
            functools.partial(_self_output_kernel, eps=eps),
            out_shape=jax.ShapeDtypeStruct((N, H), out_dtype),
            grid_spec=pltpu.PrefetchScalarGridSpec(
                num_scalar_prefetch=0,
                grid=grid,
                in_specs=[
                    pl.BlockSpec((tm, Ph), lambda i: (i, 0)),   # x row tile
                    pl.BlockSpec((tm, H), lambda i: (i, 0)),    # residual tile
                    _const_spec((Ph, H)),                       # weight (resident)
                    _const_spec((3, H)),                        # [b; gamma; beta]
                ],
                out_specs=pl.BlockSpec((tm, H), lambda i: (i, 0)),
            ),
            compiler_params=pltpu.CompilerParams(
                dimension_semantics=("parallel",),
                vmem_limit_bytes=vmem_limit,
            ),
            cost_estimate=cost,
        )

    try:
        out = _build(use_buffered=True)(x2, r2, w_t, pvec)
    except Exception:
        # Fallback for Pallas versions without BlockSpec pipeline_mode support.
        out = _build(use_buffered=False)(x2, r2, w_t, pvec)

    return out.reshape(B, S, H)


def _reference(hidden_states, input_tensor, params, eps=1e-12):
    y = jnp.einsum("bsp,hp->bsh", hidden_states, params["dense_w"]) + params["dense_b"]
    y = y + input_tensor
    mean = jnp.mean(y, axis=-1, keepdims=True)
    var = jnp.mean((y - mean) ** 2, axis=-1, keepdims=True)
    return (y - mean) * jax.lax.rsqrt(var + eps) * params["ln_w"] + params["ln_b"]


if __name__ == "__main__":
    # Config: prun_hidden_size=32, hidden_size=32, layer_norm_eps=1e-12
    B, S, PRUN_HIDDEN, HIDDEN = 2, 8, 32, 32
    EPS = 1e-12

    key = jax.random.PRNGKey(0)
    k1, k2, k3, k4, k5, k6 = jax.random.split(key, 6)

    hidden_states = jax.random.normal(k1, (B, S, PRUN_HIDDEN), dtype=jnp.float32)
    input_tensor = jax.random.normal(k2, (B, S, HIDDEN), dtype=jnp.float32)

    params = {
        "dense_w": jax.random.normal(k3, (HIDDEN, PRUN_HIDDEN), dtype=jnp.float32) * 0.02,
        "dense_b": jax.random.normal(k4, (HIDDEN,), dtype=jnp.float32) * 0.02,
        "ln_w": jnp.ones((HIDDEN,), dtype=jnp.float32)
                + 0.01 * jax.random.normal(k5, (HIDDEN,), dtype=jnp.float32),
        "ln_b": 0.01 * jax.random.normal(k6, (HIDDEN,), dtype=jnp.float32),
    }

    out = costeff_self_output(hidden_states, input_tensor, params, eps=EPS)
    out = jax.block_until_ready(out)

    ref = _reference(hidden_states, input_tensor, params, eps=EPS)
    assert out.shape == (B, S, HIDDEN)
    assert jnp.allclose(out, ref, atol=1e-4, rtol=1e-4), "mismatch vs reference"

    print("KERNEL_OK")
</pallas_src>

<mosaic_0001>
module attributes {stable_mosaic.version = 11 : i64} {
  func.func @_self_output_kernel(%arg0: i32, %arg1: memref<8x32xf32, #tpu.memory_space<vmem>>, %arg2: memref<8x32xf32, #tpu.memory_space<vmem>>, %arg3: memref<32x32xf32, #tpu.memory_space<vmem>>, %arg4: memref<3x32xf32, #tpu.memory_space<vmem>>, %arg5: memref<8x32xf32, #tpu.memory_space<vmem>>) attributes {dimension_semantics = [#tpu.dimension_semantics<parallel>], iteration_bounds = array<i64: 2>, scalar_prefetch = 0 : i64, scratch_operands = 0 : i64, tpu.core_type = #tpu.core_type<tc>, window_params = [{transform_indices = @transform_0, window_bounds = array<i64: 8, 32>}, {transform_indices = @transform_1, window_bounds = array<i64: 8, 32>}, {pipeline_mode = #tpu.pipeline_mode<synchronous>, transform_indices = @transform_2, window_bounds = array<i64: 32, 32>}, {pipeline_mode = #tpu.pipeline_mode<synchronous>, transform_indices = @transform_3, window_bounds = array<i64: 3, 32>}, {transform_indices = @transform_4, window_bounds = array<i64: 8, 32>}]} {
    %c0 = arith.constant 0 : index
    %c0_0 = arith.constant 0 : index
    %0 = vector.load %arg1[%c0, %c0_0] : memref<8x32xf32, #tpu.memory_space<vmem>>, vector<8x32xf32>
    %c0_1 = arith.constant 0 : index
    %c0_2 = arith.constant 0 : index
    %1 = vector.load %arg3[%c0_1, %c0_2] : memref<32x32xf32, #tpu.memory_space<vmem>>, vector<32x32xf32>
    %cst = arith.constant dense<0.000000e+00> : vector<8x32xf32>
    %2 = tpu.matmul %0, %1, %cst {dimension_numbers = #tpu.dot_dimension_numbers<[1], [0], [0], [1], [0, 0, 1, 1], [], []>} : vector<8x32xf32>, vector<32x32xf32>, vector<8x32xf32> -> vector<8x32xf32>
    %c0_3 = arith.constant 0 : index
    %c0_4 = arith.constant 0 : index
    %3 = vector.load %arg4[%c0_3, %c0_4] : memref<3x32xf32, #tpu.memory_space<vmem>>, vector<1x32xf32>
    %4 = vector.broadcast %3 : vector<1x32xf32> to vector<8x32xf32>
    %5 = arith.addf %2, %4 : vector<8x32xf32>
    %c0_5 = arith.constant 0 : index
    %c0_6 = arith.constant 0 : index
    %6 = vector.load %arg2[%c0_5, %c0_6] : memref<8x32xf32, #tpu.memory_space<vmem>>, vector<8x32xf32>
    %7 = arith.addf %5, %6 : vector<8x32xf32>
    %cst_7 = arith.constant dense<0.000000e+00> : vector<8xf32>
    %8 = vector.multi_reduction <add>, %7, %cst_7 [1] : vector<8x32xf32> to vector<8xf32>
    %9 = vector.shape_cast %8 : vector<8xf32> to vector<8x1xf32>
    %cst_8 = arith.constant 3.125000e-02 : f32
    %10 = vector.broadcast %cst_8 : f32 to vector<8x1xf32>
    %11 = arith.mulf %9, %10 : vector<8x1xf32>
    %12 = vector.broadcast %11 : vector<8x1xf32> to vector<8x32xf32>
    %13 = arith.subf %7, %12 : vector<8x32xf32>
    %14 = arith.mulf %13, %13 : vector<8x32xf32>
    %cst_9 = arith.constant dense<0.000000e+00> : vector<8xf32>
    %15 = vector.multi_reduction <add>, %14, %cst_9 [1] : vector<8x32xf32> to vector<8xf32>
    %16 = vector.shape_cast %15 : vector<8xf32> to vector<8x1xf32>
    %cst_10 = arith.constant 3.125000e-02 : f32
    %17 = vector.broadcast %cst_10 : f32 to vector<8x1xf32>
    %18 = arith.mulf %16, %17 : vector<8x1xf32>
    %cst_11 = arith.constant 9.99999996E-13 : f32
    %19 = vector.broadcast %cst_11 : f32 to vector<8x1xf32>
    %20 = arith.addf %18, %19 : vector<8x1xf32>
    %21 = math.rsqrt %20 : vector<8x1xf32>
    %22 = vector.broadcast %21 : vector<8x1xf32> to vector<8x32xf32>
    %23 = arith.mulf %13, %22 : vector<8x32xf32>
    %c1 = arith.constant 1 : index
    %c0_12 = arith.constant 0 : index
    %24 = vector.load %arg4[%c1, %c0_12] : memref<3x32xf32, #tpu.memory_space<vmem>>, vector<1x32xf32>
    %25 = vector.broadcast %24 : vector<1x32xf32> to vector<8x32xf32>
    %26 = arith.mulf %23, %25 : vector<8x32xf32>
    %c2 = arith.constant 2 : index
    %c0_13 = arith.constant 0 : index
    %27 = vector.load %arg4[%c2, %c0_13] : memref<3x32xf32, #tpu.memory_space<vmem>>, vector<1x32xf32>
    %28 = vector.broadcast %27 : vector<1x32xf32> to vector<8x32xf32>
    %29 = arith.addf %26, %28 : vector<8x32xf32>
    %c0_14 = arith.constant 0 : index
    %c0_15 = arith.constant 0 : index
    %30 = vector.load %arg5[%c0_14, %c0_15] : memref<8x32xf32, #tpu.memory_space<vmem>>, vector<8x32xf32>
    tpu.vector_store %arg5[%c0_14, %c0_15], %29 {strides = array<i32>} : memref<8x32xf32, #tpu.memory_space<vmem>>, vector<8x32xf32>,
    return
  }
  func.func @transform_0(%arg0: i32) -> (i32, i32) {
    %c0_i32 = arith.constant 0 : i32
    %c0_i32_0 = arith.constant 0 : i32
    return %arg0, %c0_i32 : i32, i32
  }
  func.func @transform_1(%arg0: i32) -> (i32, i32) {
    %c0_i32 = arith.constant 0 : i32
    %c0_i32_0 = arith.constant 0 : i32
    return %arg0, %c0_i32 : i32, i32
  }
  func.func @transform_2(%arg0: i32) -> (i32, i32) {
    %c0_i32 = arith.constant 0 : i32
    %c0_i32_0 = arith.constant 0 : i32
    %c0_i32_1 = arith.constant 0 : i32
    return %c0_i32, %c0_i32_0 : i32, i32
  }
  func.func @transform_3(%arg0: i32) -> (i32, i32) {
    %c0_i32 = arith.constant 0 : i32
    %c0_i32_0 = arith.constant 0 : i32
    %c0_i32_1 = arith.constant 0 : i32
    return %c0_i32, %c0_i32_0 : i32, i32
  }
  func.func @transform_4(%arg0: i32) -> (i32, i32) {
    %c0_i32 = arith.constant 0 : i32
    %c0_i32_0 = arith.constant 0 : i32
    return %arg0, %c0_i32 : i32, i32
  }
}

module attributes {stable_mosaic.version = 11 : i64} {
  func.func @_self_output_kernel(%arg0: i32, %arg1: memref<8x32xf32, #tpu.memory_space<vmem>>, %arg2: memref<8x32xf32, #tpu.memory_space<vmem>>, %arg3: memref<32x32xf32, #tpu.memory_space<vmem>>, %arg4: memref<3x32xf32, #tpu.memory_space<vmem>>, %arg5: memref<8x32xf32, #tpu.memory_space<vmem>>) attributes {dimension_semantics = [#tpu.dimension_semantics<parallel>], iteration_bounds = array<i64: 2>, scalar_prefetch = 0 : i64, scratch_operands = 0 : i64, tpu.core_type = #tpu.core_type<tc>, window_params = [{transform_indices = @transform_0, window_bounds = array<i64: 8, 32>}, {transform_indices = @transform_1, window_bounds = array<i64: 8, 32>}, {pipeline_mode = #tpu.pipeline_mode<synchronous>, transform_indices = @transform_2, window_bounds = array<i64: 32, 32>}, {pipeline_mode = #tpu.pipeline_mode<synchronous>, transform_indices = @transform_3, window_bounds = array<i64: 3, 32>}, {transform_indices = @transform_4, window_bounds = array<i64: 8, 32>}]} {
    %c0 = arith.constant 0 : index
    %c0_0 = arith.constant 0 : index
    %0 = vector.load %arg1[%c0, %c0_0] : memref<8x32xf32, #tpu.memory_space<vmem>>, vector<8x32xf32>
    %c0_1 = arith.constant 0 : index
    %c0_2 = arith.constant 0 : index
    %1 = vector.load %arg3[%c0_1, %c0_2] : memref<32x32xf32, #tpu.memory_space<vmem>>, vector<32x32xf32>
    %cst = arith.constant dense<0.000000e+00> : vector<8x32xf32>
    %2 = tpu.matmul %0, %1, %cst {dimension_numbers = #tpu.dot_dimension_numbers<[1], [0], [0], [1], [0, 0, 1, 1], [], []>} : vector<8x32xf32>, vector<32x32xf32>, vector<8x32xf32> -> vector<8x32xf32>
    %c0_3 = arith.constant 0 : index
    %c0_4 = arith.constant 0 : index
    %3 = vector.load %arg4[%c0_3, %c0_4] : memref<3x32xf32, #tpu.memory_space<vmem>>, vector<1x32xf32>
    %4 = vector.broadcast %3 : vector<1x32xf32> to vector<8x32xf32>
    %5 = arith.addf %2, %4 : vector<8x32xf32>
    %c0_5 = arith.constant 0 : index
    %c0_6 = arith.constant 0 : index
    %6 = vector.load %arg2[%c0_5, %c0_6] : memref<8x32xf32, #tpu.memory_space<vmem>>, vector<8x32xf32>
    %7 = arith.addf %5, %6 : vector<8x32xf32>
    %cst_7 = arith.constant dense<0.000000e+00> : vector<8xf32>
    %8 = vector.multi_reduction <add>, %7, %cst_7 [1] : vector<8x32xf32> to vector<8xf32>
    %9 = vector.shape_cast %8 : vector<8xf32> to vector<8x1xf32>
    %cst_8 = arith.constant 3.125000e-02 : f32
    %10 = vector.broadcast %cst_8 : f32 to vector<8x1xf32>
    %11 = arith.mulf %9, %10 : vector<8x1xf32>
    %12 = vector.broadcast %11 : vector<8x1xf32> to vector<8x32xf32>
    %13 = arith.subf %7, %12 : vector<8x32xf32>
    %14 = arith.mulf %13, %13 : vector<8x32xf32>
    %cst_9 = arith.constant dense<0.000000e+00> : vector<8xf32>
    %15 = vector.multi_reduction <add>, %14, %cst_9 [1] : vector<8x32xf32> to vector<8xf32>
    %16 = vector.shape_cast %15 : vector<8xf32> to vector<8x1xf32>
    %cst_10 = arith.constant 3.125000e-02 : f32
    %17 = vector.broadcast %cst_10 : f32 to vector<8x1xf32>
    %18 = arith.mulf %16, %17 : vector<8x1xf32>
    %cst_11 = arith.constant 9.99999996E-13 : f32
    %19 = vector.broadcast %cst_11 : f32 to vector<8x1xf32>
    %20 = arith.addf %18, %19 : vector<8x1xf32>
    %21 = math.rsqrt %20 : vector<8x1xf32>
    %22 = vector.broadcast %21 : vector<8x1xf32> to vector<8x32xf32>
    %23 = arith.mulf %13, %22 : vector<8x32xf32>
    %c1 = arith.constant 1 : index
    %c0_12 = arith.constant 0 : index
    %24 = vector.load %arg4[%c1, %c0_12] : memref<3x32xf32, #tpu.memory_space<vmem>>, vector<1x32xf32>
    %25 = vector.broadcast %24 : vector<1x32xf32> to vector<8x32xf32>
    %26 = arith.mulf %23, %25 : vector<8x32xf32>
    %c2 = arith.constant 2 : index
    %c0_13 = arith.constant 0 : index
    %27 = vector.load %arg4[%c2, %c0_13] : memref<3x32xf32, #tpu.memory_space<vmem>>, vector<1x32xf32>
    %28 = vector.broadcast %27 : vector<1x32xf32> to vector<8x32xf32>
    %29 = arith.addf %26, %28 : vector<8x32xf32>
    %c0_14 = arith.constant 0 : index
    %c0_15 = arith.constant 0 : index
    %30 = vector.load %arg5[%c0_14, %c0_15] : memref<8x32xf32, #tpu.memory_space<vmem>>, vector<8x32xf32>
    tpu.vector_store %arg5[%c0_14, %c0_15], %29 {strides = array<i32>} : memref<8x32xf32, #tpu.memory_space<vmem>>, vector<8x32xf32>,
    return
  }
  func.func @transform_0(%arg0: i32) -> (i32, i32) {
    %c0_i32 = arith.constant 0 : i32
    %c0_i32_0 = arith.constant 0 : i32
    return %arg0, %c0_i32 : i32, i32
  }
  func.func @transform_1(%arg0: i32) -> (i32, i32) {
    %c0_i32 = arith.constant 0 : i32
    %c0_i32_0 = arith.constant 0 : i32
    return %arg0, %c0_i32 : i32, i32
  }
  func.func @transform_2(%arg0: i32) -> (i32, i32) {
    %c0_i32 = arith.constant 0 : i32
    %c0_i32_0 = arith.constant 0 : i32
    %c0_i32_1 = arith.constant 0 : i32
    return %c0_i32, %c0_i32_0 : i32, i32
  }
  func.func @transform_3(%arg0: i32) -> (i32, i32) {
    %c0_i32 = arith.constant 0 : i32
    %c0_i32_0 = arith.constant 0 : i32
    %c0_i32_1 = arith.constant 0 : i32
    return %c0_i32, %c0_i32_0 : i32, i32
  }
  func.func @transform_4(%arg0: i32) -> (i32, i32) {
    %c0_i32 = arith.constant 0 : i32
    %c0_i32_0 = arith.constant 0 : i32
    return %arg0, %c0_i32 : i32, i32
  }
}

</mosaic_0001>

<bundles_post_ra>
// kernel: tpu_custom_call.1
= control target key start
LH: loop header
LB: loop body
LE: loop exit
PB: predicated region body
PF: predicated region fallthrough
CT: control target
= control target key end

     0   :  { %s997_s0 = inlined_call_operand.hbm [shape: f32[16,32], index: 0, kind: input, shape index: {}]   ;;  %s998_s1 = inlined_call_operand.hbm [shape: f32[16,32], index: 1, kind: input, shape index: {}]   ;;  %s999_s2 = inlined_call_operand.hbm [shape: f32[32,32], index: 2, kind: input, shape index: {}]   ;;  %s1000_s3 = inlined_call_operand.vmem [shape: f32[3,32], index: 3, kind: input, shape index: {}]   ;;  %s1001_s4 = inlined_call_operand.hbm [shape: f32[16,32], index: 4, kind: output, shape index: {}]  }
   0x1   :  { %1006 = sst [smem:[#allocation13_spill]] %s999_s2 }
   0x2   :  { %9 = vsyncpa [#allocation3], 0 }
   0x3   :  { %11 = vsyncpa [#allocation3 + $0x1], 0 }
   0x4   :  { %12 = vsyncpa [#allocation6], 0 }
   0x5   :  { %14 = vsyncpa [#allocation6 + $0x1], 0 }
   0x6   :  { %15 = vsyncpa [#allocation4], 0 }
   0x7   :  { %17 = vsyncpa [#allocation4 + $0x1], 0  ;;  %s786_s15 = smov 0   ;;  %s788_s16 = smov 0  }
   0x8   :  { %s790_s17 = smov 0   ;;  %s792_s18 = smov 0  }
   0x9 LB: > { %s807_s19 = sadd.s32 4294967295, %s751_s18   ;;  %s492_s20 = sadd.s32 4294967294, %s751_s18   ;;  %s751_s18 = sphi %s792_s18, %s1025_s18   ;;  %s747_s17 = sphi %s790_s17, %s1024_s17   ;;  %s743_s16 = sphi %s788_s16, %s1023_s16   ;;  %s739_s15 = sphi %s786_s15, %s1022_s15  }
   0xa   : > { %p43_p0 = scmp.ne.s32.totalorder %s743_s16, %s739_s15  ;;  %p1002_p1 = scmp.eq.s32.totalorder %s807_s19, 0 }
   0xb   : > { %p141_p3 = scmp.eq.s32.totalorder %s492_s20, 1  ;;  %p493_p5 = scmp.ge.s32.totalorder %s751_s18, 1 }
   0xc   : > { %p816_p4 = por %p1002_p1, %p43_p0  ;;  %p148_p7 = scmp.lt.s32.totalorder %s751_s18, 3 }
   0xd   : > { %p821_p6 = por %p141_p3, %p43_p0  ;;  %s753_s24 = smov [#allocation7]  }
   0xe   : > { %s1007_s21 = scalar_select %p816_p4, 1, 0 }
   0xf   : > { %s1008_s22 = scalar_select %p821_p6, 1, 0 }
  0x10   : > { %p826_p8 = pnand %p493_p5, %p148_p7  ;;  %s160_s25 = sshll.u32 %s753_s24, 4  ;;  %s161_s25 = int_to_ptr.vmem [resolvable:$true] %s160_s25 }
  0x11   : > { %s840_s27 = sadd.s32 1, %s751_s18   ;;  %s30_s28 = sadd.s32 1, %s747_s17 }
  0x12   : > { %s1009_s23 = scalar_select %p826_p8, 1, 0 }
  0x13   : > { %p539_p9 = pneg %p826_p8  ;;  %s27_s29 = ssub.s32 %s751_s18, %s840_s27 }
  0x14   : > { %s608_s30 = scalar_lea.vmem %s161_s25, 512  ;;  %p616_p5 = scmp.lt.s32.totalorder %s161_s25, %s161_s25 }
  0x15   : > { %p835_p11 = pnand %p539_p9, %p1002_p1  ;;  %p609_p13 = scmp.ne.s32.totalorder %s161_s25, %s608_s30 }
  0x16   : > { %p617_p7 = scmp.lt.s32.totalorder %s608_s30, %s608_s30 }
  0x17   : > { %p599_p12 = pneg %p835_p11 }
  0x18   : > { %p618_p10 = por %p617_p7, %p616_p5 }
  0x19   : > { %p611_p0 = pnand %p609_p13, %p599_p12 }
  0x1b   : > { %p612_p3 = pneg %p611_p0 }
  0x1d   : > { %p619_p2 = pnand %p618_p10, %p612_p3 }
  0x1f   : > { %622 = shalt.err (!%p619_p2)
}
  0x20   : > { %s754_s5 = smov 128   ;;  %s755_s6 = smov 8  }
  0x21   : > { %s1011_s2 = sld [smem:[#allocation13_spill]]  ;;  %p28_p9 = scmp.eq.s32.totalorder %s27_s29, 0 }
  0x22   : > { %p37_p12 = scmp.ne.s32.totalorder %s747_s17, %s743_s16  ;;  %p38_p10 = scmp.eq.s32.totalorder %s751_s18, 0 }
  0x23   : > { %p555_p2 = scmp.lt.s32.totalorder %s751_s18, 2  ;;  %p1012_p0 = scmp.eq.s32.totalorder %s807_s19, 1 }
  0x24   : > { %s857_s9 = scalar_select %p28_p9, %s747_s17, %s30_s28  }
  0x25   : > { %p39_p13 = por %p38_p10, %p37_p12  ;;  %p861_p3 = por %p1012_p0, %p37_p12 }
  0x26   : > { %s177_s11 = sand.u32 1, %s747_s17   ;;  %s497_s12 = sshll.u32 %s751_s18, 7 }
  0x27   : > { %542 = dma.hbm_to_vmem [thread:$0]  (!%p835_p11), %s1011_s2, 512, %s161_s25, [#allocation6], %s754_s5, %s754_s5, %s755_s6  }
  0x28   : > { %s1013_s10 = scalar_select %p861_p3, 1, 0 }
  0x29   : > { %s867_s13 = sshll.u32 %s177_s11, 3  ;;  %s872_s24 = scalar_lea.hbm %s997_s0, %s497_s12 }
  0x2a   : > { %s181_s25 = scalar_lea.vmem [#allocation2], %s867_s13  ;;  %p875_p11 = pnand %p555_p2, %p39_p13 }
  0x2b   : > { %s188_s26 = sshll.u32 %s181_s25, 4  ;;  %s882_s5 = scalar_lea.hbm %s998_s1, %s497_s12  ;;  %s189_s26 = int_to_ptr.vmem [resolvable:$true] %s188_s26 }
  0x2c   : > { %s178_s6 = scalar_lea.sflag [#allocation3], %s177_s11  ;;  %s623_s7 = scalar_lea.hbm %s872_s24, 128 }
  0x2d   : > { %p624_p5 = scmp.ne.s32.totalorder %s872_s24, %s623_s7  ;;  %p625_p7 = pneg %p875_p11 }
  0x2e   : > { %s628_s20 = scalar_lea.hbm %s997_s0, 256  ;;  %p629_p10 = scmp.lt.s32.totalorder %s872_s24, %s997_s0 }
  0x2f   : > { %p626_p9 = pnand %p625_p7, %p624_p5  ;;  %p630_p2 = scmp.lt.s32.totalorder %s628_s20, %s623_s7 }
  0x31   : > { %p627_p12 = pneg %p626_p9  ;;  %p631_p13 = por %p630_p2, %p629_p10 }
  0x33   : > { %p632_p0 = pnand %p631_p13, %p627_p12 }
  0x35   : > { %635 = shalt.err (!%p632_p0)
}
  0x36   : > { %s636_s11 = scalar_lea.vmem %s189_s26, 128  ;;  %s756_s12 = smov [#allocation2]  }
  0x37   : > { %p637_p1 = scmp.ne.s32.totalorder %s189_s26, %s636_s11  ;;  %s641_s29 = sshll.u32 %s756_s12, 4  ;;  %s642_s29 = int_to_ptr.vmem [resolvable:$false] %s641_s29 }
  0x38   : > { %s643_s30 = scalar_lea.vmem %s642_s29, 256  ;;  %p644_p9 = scmp.lt.s32.totalorder %s189_s26, %s642_s29 }
  0x39   : > { %p639_p6 = pnand %p637_p1, %p625_p7  ;;  %p645_p3 = scmp.lt.s32.totalorder %s643_s30, %s636_s11 }
  0x3b   : > { %p640_p5 = pneg %p639_p6  ;;  %p646_p4 = por %p645_p3, %p644_p9 }
  0x3d   : > { %p647_p8 = pnand %p646_p4, %p640_p5 }
  0x3f   : > { %650 = shalt.err (!%p647_p8)
}
  0x40   : > { %546 = dma.hbm_to_vmem [thread:$0]  (!%p875_p11), %s872_s24, 128, %s189_s26, %s178_s6  }
  0x41   : > { %s195_s2 = sand.u32 1, %s751_s18   ;;  %s199_s7 = scalar_lea.vmem [#allocation5], %s867_s13 }
  0x42   : > { %s206_s8 = sshll.u32 %s199_s7, 4  ;;  %s196_s14 = scalar_lea.sflag [#allocation6], %s195_s2  ;;  %s207_s8 = int_to_ptr.vmem [resolvable:$true] %s206_s8 }
  0x43   : > { %s651_s20 = scalar_lea.hbm %s882_s5, 128  ;;  %s656_s12 = scalar_lea.hbm %s998_s1, 256 }
  0x44   : > { %p652_p1 = scmp.ne.s32.totalorder %s882_s5, %s651_s20  ;;  %p657_p8 = scmp.lt.s32.totalorder %s882_s5, %s998_s1 }
  0x45   : > { %p658_p3 = scmp.lt.s32.totalorder %s656_s12, %s651_s20 }
  0x46   : > { %p654_p4 = pnand %p652_p1, %p625_p7 }
  0x47   : > { %p659_p12 = por %p658_p3, %p657_p8 }
  0x48   : > { %p655_p6 = pneg %p654_p4 }
  0x4a   : > { %p660_p10 = pnand %p659_p12, %p655_p6 }
  0x4c   : > { %663 = shalt.err (!%p660_p10)
}
  0x4d   : > { %s664_s13 = scalar_lea.vmem %s207_s8, 128  ;;  %s757_s24 = smov [#allocation5]  }
  0x4e   : > { %p665_p2 = scmp.ne.s32.totalorder %s207_s8, %s664_s13  ;;  %s669_s26 = sshll.u32 %s757_s24, 4  ;;  %s670_s26 = int_to_ptr.vmem [resolvable:$false] %s669_s26 }
  0x4f   : > { %s671_s6 = scalar_lea.vmem %s670_s26, 256  ;;  %p672_p5 = scmp.lt.s32.totalorder %s207_s8, %s670_s26 }
  0x50   : > { %p667_p13 = pnand %p665_p2, %p625_p7  ;;  %p673_p9 = scmp.lt.s32.totalorder %s671_s6, %s664_s13 }
  0x52   : > { %p668_p0 = pneg %p667_p13  ;;  %p674_p1 = por %p673_p9, %p672_p5 }
  0x54   : > { %p675_p4 = pnand %p674_p1, %p668_p0 }
  0x56   : > { %678 = shalt.err (!%p675_p4)
}
  0x57   : > { %549 = dma.hbm_to_vmem [thread:$0]  (!%p875_p11), %s882_s5, 128, %s207_s8, %s196_s14  }
  0x58   : > { %p1015_p6 = scmp.ne.s32.totalorder %s1009_s23, 0 }
  0x59   : > { %s927_s2 = sand.u32 (!%p1015_p6), 1, %s743_s16   ;;  %p1016_p7 = scmp.ne.s32.totalorder (!%p1015_p6), %s1007_s21, 0 }
  0x5a   : > { %215 = sbr.rel (%p1015_p6) target bundleno = 629 (0x275), region = 36  ;;  %s930_s7 = sshll.u32 (!%p1015_p6), %s927_s2, 3 }
  0x5b   : > { %s218_s20 = scalar_lea.sflag (!%p1015_p6), [#allocation3], %s927_s2  ;;  %s221_s25 = scalar_lea.vmem (!%p1015_p6), [#allocation2], %s930_s7 }
  0x5f   : > { %722 = dma.done.wait (%p1016_p7), %s218_s20, 128  }
  0x60   : > { %724 = vsyncadd (%p1016_p7), %s218_s20, 4294967168  ;;  %s226_s23 = sand.u32 1, %s807_s19   ;;  %s230_s5 = scalar_lea.vmem [#allocation5], %s930_s7 }
  0x61   : > { %s227_s28 = scalar_lea.sflag [#allocation6], %s226_s23 }
  0x62   : > { %726 = dma.done.wait (%p1016_p7), %s227_s28, 128  }
  0x63   : > { %728 = vsyncadd (%p1016_p7), %s227_s28, 4294967168  ;;  %p1017_p11 = scmp.eq.s32.totalorder %s807_s19, 0 }
  0x65   : > { %730 = dma.done.wait (%p1017_p11), [#allocation6], 512   ;;  %p1018_p8 = pmov %p1017_p11 }
  0x66   : > { %v758_v0 = vmov 0.0   ;;  %vm759_vm0 = vmmov 0   ;;  %v268_v1 = vld [vmem:[#allocation7 + $0x18] sm:$0xff]  ;;  %v267_v2 = vld [vmem:[#allocation7 + $0x10] sm:$0xff]  ;;  %v266_v3 = vld [vmem:[#allocation7 + $0x8] sm:$0xff]  ;;  %vm274_vm1 = vcmask 261120  }
  0x67   : > { %732 = vsyncadd (%p1018_p8), [#allocation6], 4294966784  ;;  %518 = vmatprep.subr.mxu0 %v758_v0  ;;  %526 = vmatprep.mubr.msk.f32.mxu0 %vm759_vm0, %v758_v0  ;;  %v265_v4 = vld [vmem:[#allocation7] sm:$0xff]  ;;  %v348_v8 = vld [vmem:[%s230_s5] sm:$0xff]  ;;  %s510_s30 = sshll.u32 %s807_s19, 7  ;;  %s263_s13 = scalar_lea.vmem [#allocation8], %s930_s7 }
  0x68   : > { %519 = vmatpush3.msra.mxu0 %v268_v1  ;;  %v264_v5 = vld [vmem:[%s221_s25] sm:$0xff]  ;;  %s390_s24 = sshll.u32 %s263_s13, 4  ;;  %s388_s20 = scalar_lea.hbm %s1001_s4, %s510_s30  ;;  %s391_s24 = int_to_ptr.vmem [resolvable:$true] %s390_s24 }
  0x69   : > { %520 = vmatprep.subr.mxu0 %v758_v0  ;;  %v505_v6 = vld [vmem:[%s1000_s3] ss:$0 sm:$0xff]  ;;  %v507_v22 = vld [vmem:[%s1000_s3 + $0x1] ss:$0 sm:$0xff]  ;;  %v508_v24 = vld [vmem:[%s1000_s3 + $0x2] ss:$0 sm:$0xff] }
  0x6a   : > { %521 = vmatpush3.msra.mxu0 %v267_v2  ;;  %s377_s25 = scalar_lea.sflag [#allocation4], %s927_s2  ;;  %s679_s23 = scalar_lea.vmem %s391_s24, 128 }
  0x6b   : > { %522 = vmatprep.subr.mxu0 %v758_v0  ;;  %p680_p3 = scmp.ne.s32.totalorder %s391_s24, %s679_s23  ;;  %p1019_p12 = scmp.ne.s32.totalorder %s1013_s10, 0 }
  0x6c   : > { %523 = vmatpush3.msra.mxu0 %v266_v3  ;;  %s760_s28 = smov [#allocation8]  }
  0x6d   : > { %524 = vmatprep.subr.mxu0 %v758_v0  ;;  %p681_p10 = pnand %p680_p3, %p1019_p12  ;;  %s683_s5 = sshll.u32 %s760_s28, 4  ;;  %s684_s5 = int_to_ptr.vmem [resolvable:$false] %s683_s5 }
  0x6e   : > { %525 = vmatpush3.msra.mxu0 %v265_v4  ;;  %s685_s19 = scalar_lea.vmem %s684_s5, 256  ;;  %p686_p13 = scmp.lt.s32.totalorder %s391_s24, %s684_s5 }
  0x6f   : > { %527 = vmatmul.mubr.msk.f32.vlgmr.msra.gmra.mxu0 %vm274_vm1, %v264_v5  ;;  %p682_p2 = pneg %p681_p10  ;;  %p687_p0 = scmp.lt.s32.totalorder %s685_s19, %s679_s23 }
  0x71   : > { %p688_p5 = por %p687_p0, %p686_p13 }
  0x73   : > { %p689_p9 = pnand %p688_p5, %p682_p2 }
 0x12f   : > { %v344_v7 = vpop.f32.mrf.mxu0 }
 0x130   : > { %v345_v9 = vadd.f32 %v505_v6, %v344_v7 }
 0x131   : > { %v528_v10 = vpop.f32.mrf.mxu0 }
 0x132   : > { %v349_v11 = vadd.f32 %v348_v8, %v345_v9 }
 0x134   : > { %v350_v12 = vsel %vm274_vm1, %v349_v11, 0.0 }
 0x135   : > { %351 = vadd.xlane.f32.xlu0 %v350_v12 }
 0x1be   : > { %v352_v13 = vpop.xlane.xlu0 %351 }
 0x1bf   : > { %v353_v14 = vmul.f32 0.03125, %v352_v13 }
 0x1c1   : > { %v354_v15 = vsub.f32 %v349_v11, %v353_v14 }
 0x1c3   : > { %v355_v16 = vmul.f32 %v354_v15, %v354_v15 }
 0x1c5   : > { %v356_v17 = vsel %vm274_vm1, %v355_v16, 0.0 }
 0x1c6   : > { %357 = vadd.xlane.f32.xlu0 %v356_v17 }
 0x24f   : > { %v358_v18 = vpop.xlane.xlu0 %357 }
 0x250   : > { %v359_v19 = vmul.f32 0.03125, %v358_v18 }
 0x252   : > { %v360_v20 = vadd.f32 1e-12, %v359_v19 }
 0x254   : > { %595 = vrsqrt.f32 %v360_v20 }
 0x261   : > { %v596_v21 = vpop.eup %595 }
 0x262   : > { %v362_v23 = vmul.f32 %v596_v21, %v354_v15 }
 0x264   : > { %v368_v25 = vmul.f32 %v507_v22, %v362_v23 }
 0x266   : > { %v374_v26 = vadd.f32 %v508_v24, %v368_v25 }
 0x268   : > { %375 = vst.msk [vmem:[%s263_s13] sm:$0xff] %vm274_vm1, %v374_v26 }
 0x269   : > { %692 = shalt.err (!%p689_p9)
}
 0x26a   : > { %s693_s7 = scalar_lea.hbm %s388_s20, 128  ;;  %s697_s8 = scalar_lea.hbm %s1001_s4, 256 }
 0x26b   : > { %p694_p1 = scmp.ne.s32.totalorder %s388_s20, %s693_s7  ;;  %p698_p7 = scmp.lt.s32.totalorder %s388_s20, %s1001_s4 }
 0x26c   : > { %p699_p11 = scmp.lt.s32.totalorder %s697_s8, %s693_s7 }
 0x26d   : > { %p695_p4 = pnand %p694_p1, %p1019_p12 }
 0x26e   : > { %p700_p8 = por %p699_p11, %p698_p7 }
 0x26f   : > { %p696_p6 = pneg %p695_p4 }
 0x271   : > { %p701_p3 = pnand %p700_p8, %p696_p6 }
 0x273   : > { %704 = shalt.err (!%p701_p3)
}
 0x274   : > { %537 = dma.vmem_to_hbm [thread:$0]  (%p1019_p12), %s391_s24, 128, %s388_s20, %s377_s25  }
 0x275 PF: > { %s402_s12 = sand.u32 1, %s739_s15   ;;  %p1020_p10 = scmp.ne.s32.totalorder %s1008_s22, 0 }
 0x276   : > { %p1021_p2 = scmp.ge.s32.totalorder %s751_s18, 2  ;;  %s403_s29 = scalar_lea.sflag [#allocation4], %s402_s12 }
 0x278   : > { %p551_p13 = pnand %p1021_p2, %p1020_p10 }
 0x27a   : > { %p552_p0 = pneg %p551_p13 }
 0x27c   : > { %734 = dma.done.wait (%p552_p0), %s403_s29, 128  }
 0x27d   : > { %736 = vsyncadd (%p552_p0), %s403_s29, 4294967168  ;;  %p20_p5 = scmp.ge.s32.totalorder %s840_s27, 4   ;;  %s1022_s15 = smov %s743_s16 }
 0x27e   : > { %s1023_s16 = smov %s747_s17  ;;  %s1024_s17 = smov %s857_s9 }
 0x27f   : > { %s1025_s18 = smov %s840_s27  ;;  %22 = sbr.rel (!%p20_p5) target bundleno = 9 (0x9), region = 98 }
 0x284   :  { %408 = vsyncpa [#allocation3], 1 }
 0x285   :  { %410 = vsyncpa [#allocation3 + $0x1], 1 }
 0x286   :  { %411 = vsyncpa [#allocation6], 1 }
 0x287   :  { %413 = vsyncpa [#allocation6 + $0x1], 1 }
 0x288   :  { %414 = vsyncpa [#allocation4], 1 }
 0x289   :  { %416 = vsyncpa [#allocation4 + $0x1], 1 }

// kernel: tpu_custom_call.1
= control target key start
LH: loop header
LB: loop body
LE: loop exit
PB: predicated region body
PF: predicated region fallthrough
CT: control target
= control target key end

     0   :  { %s997_s0 = inlined_call_operand.hbm [shape: f32[16,32], index: 0, kind: input, shape index: {}]   ;;  %s998_s1 = inlined_call_operand.hbm [shape: f32[16,32], index: 1, kind: input, shape index: {}]   ;;  %s999_s2 = inlined_call_operand.hbm [shape: f32[32,32], index: 2, kind: input, shape index: {}]   ;;  %s1000_s3 = inlined_call_operand.vmem [shape: f32[3,32], index: 3, kind: input, shape index: {}]   ;;  %s1001_s4 = inlined_call_operand.hbm [shape: f32[16,32], index: 4, kind: output, shape index: {}]  }
   0x1   :  { %1006 = sst [smem:[#allocation13_spill]] %s999_s2 }
   0x2   :  { %9 = vsyncpa [#allocation3], 0 }
   0x3   :  { %11 = vsyncpa [#allocation3 + $0x1], 0 }
   0x4   :  { %12 = vsyncpa [#allocation6], 0 }
   0x5   :  { %14 = vsyncpa [#allocation6 + $0x1], 0 }
   0x6   :  { %15 = vsyncpa [#allocation4], 0 }
   0x7   :  { %17 = vsyncpa [#allocation4 + $0x1], 0  ;;  %s786_s15 = smov 0   ;;  %s788_s16 = smov 0  }
   0x8   :  { %s790_s17 = smov 0   ;;  %s792_s18 = smov 0  }
   0x9 LB: > { %s807_s19 = sadd.s32 4294967295, %s751_s18   ;;  %s492_s20 = sadd.s32 4294967294, %s751_s18   ;;  %s751_s18 = sphi %s792_s18, %s1025_s18   ;;  %s747_s17 = sphi %s790_s17, %s1024_s17   ;;  %s743_s16 = sphi %s788_s16, %s1023_s16   ;;  %s739_s15 = sphi %s786_s15, %s1022_s15  }
   0xa   : > { %p43_p0 = scmp.ne.s32.totalorder %s743_s16, %s739_s15  ;;  %p1002_p1 = scmp.eq.s32.totalorder %s807_s19, 0 }
   0xb   : > { %p141_p3 = scmp.eq.s32.totalorder %s492_s20, 1  ;;  %p493_p5 = scmp.ge.s32.totalorder %s751_s18, 1 }
   0xc   : > { %p816_p4 = por %p1002_p1, %p43_p0  ;;  %p148_p7 = scmp.lt.s32.totalorder %s751_s18, 3 }
   0xd   : > { %p821_p6 = por %p141_p3, %p43_p0  ;;  %s753_s24 = smov [#allocation7]  }
   0xe   : > { %s1007_s21 = scalar_select %p816_p4, 1, 0 }
   0xf   : > { %s1008_s22 = scalar_select %p821_p6, 1, 0 }
  0x10   : > { %p826_p8 = pnand %p493_p5, %p148_p7  ;;  %s160_s25 = sshll.u32 %s753_s24, 4  ;;  %s161_s25 = int_to_ptr.vmem [resolvable:$true] %s160_s25 }
  0x11   : > { %s840_s27 = sadd.s32 1, %s751_s18   ;;  %s30_s28 = sadd.s32 1, %s747_s17 }
  0x12   : > { %s1009_s23 = scalar_select %p826_p8, 1, 0 }
  0x13   : > { %p539_p9 = pneg %p826_p8  ;;  %s27_s29 = ssub.s32 %s751_s18, %s840_s27 }
  0x14   : > { %s608_s30 = scalar_lea.vmem %s161_s25, 512  ;;  %p616_p5 = scmp.lt.s32.totalorder %s161_s25, %s161_s25 }
  0x15   : > { %p835_p11 = pnand %p539_p9, %p1002_p1  ;;  %p609_p13 = scmp.ne.s32.totalorder %s161_s25, %s608_s30 }
  0x16   : > { %p617_p7 = scmp.lt.s32.totalorder %s608_s30, %s608_s30 }
  0x17   : > { %p599_p12 = pneg %p835_p11 }
  0x18   : > { %p618_p10 = por %p617_p7, %p616_p5 }
  0x19   : > { %p611_p0 = pnand %p609_p13, %p599_p12 }
  0x1b   : > { %p612_p3 = pneg %p611_p0 }
  0x1d   : > { %p619_p2 = pnand %p618_p10, %p612_p3 }
  0x1f   : > { %622 = shalt.err (!%p619_p2)
}
  0x20   : > { %s754_s5 = smov 128   ;;  %s755_s6 = smov 8  }
  0x21   : > { %s1011_s2 = sld [smem:[#allocation13_spill]]  ;;  %p28_p9 = scmp.eq.s32.totalorder %s27_s29, 0 }
  0x22   : > { %p37_p12 = scmp.ne.s32.totalorder %s747_s17, %s743_s16  ;;  %p38_p10 = scmp.eq.s32.totalorder %s751_s18, 0 }
  0x23   : > { %p555_p2 = scmp.lt.s32.totalorder %s751_s18, 2  ;;  %p1012_p0 = scmp.eq.s32.totalorder %s807_s19, 1 }
  0x24   : > { %s857_s9 = scalar_select %p28_p9, %s747_s17, %s30_s28  }
  0x25   : > { %p39_p13 = por %p38_p10, %p37_p12  ;;  %p861_p3 = por %p1012_p0, %p37_p12 }
  0x26   : > { %s177_s11 = sand.u32 1, %s747_s17   ;;  %s497_s12 = sshll.u32 %s751_s18, 7 }
  0x27   : > { %542 = dma.hbm_to_vmem [thread:$0]  (!%p835_p11), %s1011_s2, 512, %s161_s25, [#allocation6], %s754_s5, %s754_s5, %s755_s6  }
  0x28   : > { %s1013_s10 = scalar_select %p861_p3, 1, 0 }
  0x29   : > { %s867_s13 = sshll.u32 %s177_s11, 3  ;;  %s872_s24 = scalar_lea.hbm %s997_s0, %s497_s12 }
  0x2a   : > { %s181_s25 = scalar_lea.vmem [#allocation2], %s867_s13  ;;  %p875_p11 = pnand %p555_p2, %p39_p13 }
  0x2b   : > { %s188_s26 = sshll.u32 %s181_s25, 4  ;;  %s882_s5 = scalar_lea.hbm %s998_s1, %s497_s12  ;;  %s189_s26 = int_to_ptr.vmem [resolvable:$true] %s188_s26 }
  0x2c   : > { %s178_s6 = scalar_lea.sflag [#allocation3], %s177_s11  ;;  %s623_s7 = scalar_lea.hbm %s872_s24, 128 }
  0x2d   : > { %p624_p5 = scmp.ne.s32.totalorder %s872_s24, %s623_s7  ;;  %p625_p7 = pneg %p875_p11 }
  0x2e   : > { %s628_s20 = scalar_lea.hbm %s997_s0, 256  ;;  %p629_p10 = scmp.lt.s32.totalorder %s872_s24, %s997_s0 }
  0x2f   : > { %p626_p9 = pnand %p625_p7, %p624_p5  ;;  %p630_p2 = scmp.lt.s32.totalorder %s628_s20, %s623_s7 }
  0x31   : > { %p627_p12 = pneg %p626_p9  ;;  %p631_p13 = por %p630_p2, %p629_p10 }
  0x33   : > { %p632_p0 = pnand %p631_p13, %p627_p12 }
  0x35   : > { %635 = shalt.err (!%p632_p0)
}
  0x36   : > { %s636_s11 = scalar_lea.vmem %s189_s26, 128  ;;  %s756_s12 = smov [#allocation2]  }
  0x37   : > { %p637_p1 = scmp.ne.s32.totalorder %s189_s26, %s636_s11  ;;  %s641_s29 = sshll.u32 %s756_s12, 4  ;;  %s642_s29 = int_to_ptr.vmem [resolvable:$false] %s641_s29 }
  0x38   : > { %s643_s30 = scalar_lea.vmem %s642_s29, 256  ;;  %p644_p9 = scmp.lt.s32.totalorder %s189_s26, %s642_s29 }
  0x39   : > { %p639_p6 = pnand %p637_p1, %p625_p7  ;;  %p645_p3 = scmp.lt.s32.totalorder %s643_s30, %s636_s11 }
  0x3b   : > { %p640_p5 = pneg %p639_p6  ;;  %p646_p4 = por %p645_p3, %p644_p9 }
  0x3d   : > { %p647_p8 = pnand %p646_p4, %p640_p5 }
  0x3f   : > { %650 = shalt.err (!%p647_p8)
}
  0x40   : > { %546 = dma.hbm_to_vmem [thread:$0]  (!%p875_p11), %s872_s24, 128, %s189_s26, %s178_s6  }
  0x41   : > { %s195_s2 = sand.u32 1, %s751_s18   ;;  %s199_s7 = scalar_lea.vmem [#allocation5], %s867_s13 }
  0x42   : > { %s206_s8 = sshll.u32 %s199_s7, 4  ;;  %s196_s14 = scalar_lea.sflag [#allocation6], %s195_s2  ;;  %s207_s8 = int_to_ptr.vmem [resolvable:$true] %s206_s8 }
  0x43   : > { %s651_s20 = scalar_lea.hbm %s882_s5, 128  ;;  %s656_s12 = scalar_lea.hbm %s998_s1, 256 }
  0x44   : > { %p652_p1 = scmp.ne.s32.totalorder %s882_s5, %s651_s20  ;;  %p657_p8 = scmp.lt.s32.totalorder %s882_s5, %s998_s1 }
  0x45   : > { %p658_p3 = scmp.lt.s32.totalorder %s656_s12, %s651_s20 }
  0x46   : > { %p654_p4 = pnand %p652_p1, %p625_p7 }
  0x47   : > { %p659_p12 = por %p658_p3, %p657_p8 }
  0x48   : > { %p655_p6 = pneg %p654_p4 }
  0x4a   : > { %p660_p10 = pnand %p659_p12, %p655_p6 }
  0x4c   : > { %663 = shalt.err (!%p660_p10)
}
  0x4d   : > { %s664_s13 = scalar_lea.vmem %s207_s8, 128  ;;  %s757_s24 = smov [#allocation5]  }
  0x4e   : > { %p665_p2 = scmp.ne.s32.totalorder %s207_s8, %s664_s13  ;;  %s669_s26 = sshll.u32 %s757_s24, 4  ;;  %s670_s26 = int_to_ptr.vmem [resolvable:$false] %s669_s26 }
  0x4f   : > { %s671_s6 = scalar_lea.vmem %s670_s26, 256  ;;  %p672_p5 = scmp.lt.s32.totalorder %s207_s8, %s670_s26 }
  0x50   : > { %p667_p13 = pnand %p665_p2, %p625_p7  ;;  %p673_p9 = scmp.lt.s32.totalorder %s671_s6, %s664_s13 }
  0x52   : > { %p668_p0 = pneg %p667_p13  ;;  %p674_p1 = por %p673_p9, %p672_p5 }
  0x54   : > { %p675_p4 = pnand %p674_p1, %p668_p0 }
  0x56   : > { %678 = shalt.err (!%p675_p4)
}
  0x57   : > { %549 = dma.hbm_to_vmem [thread:$0]  (!%p875_p11), %s882_s5, 128, %s207_s8, %s196_s14  }
  0x58   : > { %p1015_p6 = scmp.ne.s32.totalorder %s1009_s23, 0 }
  0x59   : > { %s927_s2 = sand.u32 (!%p1015_p6), 1, %s743_s16   ;;  %p1016_p7 = scmp.ne.s32.totalorder (!%p1015_p6), %s1007_s21, 0 }
  0x5a   : > { %215 = sbr.rel (%p1015_p6) target bundleno = 629 (0x275), region = 36  ;;  %s930_s7 = sshll.u32 (!%p1015_p6), %s927_s2, 3 }
  0x5b   : > { %s218_s20 = scalar_lea.sflag (!%p1015_p6), [#allocation3], %s927_s2  ;;  %s221_s25 = scalar_lea.vmem (!%p1015_p6), [#allocation2], %s930_s7 }
  0x5f   : > { %722 = dma.done.wait (%p1016_p7), %s218_s20, 128  }
  0x60   : > { %724 = vsyncadd (%p1016_p7), %s218_s20, 4294967168  ;;  %s226_s23 = sand.u32 1, %s807_s19   ;;  %s230_s5 = scalar_lea.vmem [#allocation5], %s930_s7 }
  0x61   : > { %s227_s28 = scalar_lea.sflag [#allocation6], %s226_s23 }
  0x62   : > { %726 = dma.done.wait (%p1016_p7), %s227_s28, 128  }
  0x63   : > { %728 = vsyncadd (%p1016_p7), %s227_s28, 4294967168  ;;  %p1017_p11 = scmp.eq.s32.totalorder %s807_s19, 0 }
  0x65   : > { %730 = dma.done.wait (%p1017_p11), [#allocation6], 512   ;;  %p1018_p8 = pmov %p1017_p11 }
  0x66   : > { %v758_v0 = vmov 0.0   ;;  %vm759_vm0 = vmmov 0   ;;  %v268_v1 = vld [vmem:[#allocation7 + $0x18] sm:$0xff]  ;;  %v267_v2 = vld [vmem:[#allocation7 + $0x10] sm:$0xff]  ;;  %v266_v3 = vld [vmem:[#allocation7 + $0x8] sm:$0xff]  ;;  %vm274_vm1 = vcmask 261120  }
  0x67   : > { %732 = vsyncadd (%p1018_p8), [#allocation6], 4294966784  ;;  %518 = vmatprep.subr.mxu0 %v758_v0  ;;  %526 = vmatprep.mubr.msk.f32.mxu0 %vm759_vm0, %v758_v0  ;;  %v265_v4 = vld [vmem:[#allocation7] sm:$0xff]  ;;  %v348_v8 = vld [vmem:[%s230_s5] sm:$0xff]  ;;  %s510_s30 = sshll.u32 %s807_s19, 7  ;;  %s263_s13 = scalar_lea.vmem [#allocation8], %s930_s7 }
  0x68   : > { %519 = vmatpush3.msra.mxu0 %v268_v1  ;;  %v264_v5 = vld [vmem:[%s221_s25] sm:$0xff]  ;;  %s390_s24 = sshll.u32 %s263_s13, 4  ;;  %s388_s20 = scalar_lea.hbm %s1001_s4, %s510_s30  ;;  %s391_s24 = int_to_ptr.vmem [resolvable:$true] %s390_s24 }
  0x69   : > { %520 = vmatprep.subr.mxu0 %v758_v0  ;;  %v505_v6 = vld [vmem:[%s1000_s3] ss:$0 sm:$0xff]  ;;  %v507_v22 = vld [vmem:[%s1000_s3 + $0x1] ss:$0 sm:$0xff]  ;;  %v508_v24 = vld [vmem:[%s1000_s3 + $0x2] ss:$0 sm:$0xff] }
  0x6a   : > { %521 = vmatpush3.msra.mxu0 %v267_v2  ;;  %s377_s25 = scalar_lea.sflag [#allocation4], %s927_s2  ;;  %s679_s23 = scalar_lea.vmem %s391_s24, 128 }
  0x6b   : > { %522 = vmatprep.subr.mxu0 %v758_v0  ;;  %p680_p3 = scmp.ne.s32.totalorder %s391_s24, %s679_s23  ;;  %p1019_p12 = scmp.ne.s32.totalorder %s1013_s10, 0 }
  0x6c   : > { %523 = vmatpush3.msra.mxu0 %v266_v3  ;;  %s760_s28 = smov [#allocation8]  }
  0x6d   : > { %524 = vmatprep.subr.mxu0 %v758_v0  ;;  %p681_p10 = pnand %p680_p3, %p1019_p12  ;;  %s683_s5 = sshll.u32 %s760_s28, 4  ;;  %s684_s5 = int_to_ptr.vmem [resolvable:$false] %s683_s5 }
  0x6e   : > { %525 = vmatpush3.msra.mxu0 %v265_v4  ;;  %s685_s19 = scalar_lea.vmem %s684_s5, 256  ;;  %p686_p13 = scmp.lt.s32.totalorder %s391_s24, %s684_s5 }
  0x6f   : > { %527 = vmatmul.mubr.msk.f32.vlgmr.msra.gmra.mxu0 %vm274_vm1, %v264_v5  ;;  %p682_p2 = pneg %p681_p10  ;;  %p687_p0 = scmp.lt.s32.totalorder %s685_s19, %s679_s23 }
  0x71   : > { %p688_p5 = por %p687_p0, %p686_p13 }
  0x73   : > { %p689_p9 = pnand %p688_p5, %p682_p2 }
 0x12f   : > { %v344_v7 = vpop.f32.mrf.mxu0 }
 0x130   : > { %v345_v9 = vadd.f32 %v505_v6, %v344_v7 }
 0x131   : > { %v528_v10 = vpop.f32.mrf.mxu0 }
 0x132   : > { %v349_v11 = vadd.f32 %v348_v8, %v345_v9 }
 0x134   : > { %v350_v12 = vsel %vm274_vm1, %v349_v11, 0.0 }
 0x135   : > { %351 = vadd.xlane.f32.xlu0 %v350_v12 }
 0x1be   : > { %v352_v13 = vpop.xlane.xlu0 %351 }
 0x1bf   : > { %v353_v14 = vmul.f32 0.03125, %v352_v13 }
 0x1c1   : > { %v354_v15 = vsub.f32 %v349_v11, %v353_v14 }
 0x1c3   : > { %v355_v16 = vmul.f32 %v354_v15, %v354_v15 }
 0x1c5   : > { %v356_v17 = vsel %vm274_vm1, %v355_v16, 0.0 }
 0x1c6   : > { %357 = vadd.xlane.f32.xlu0 %v356_v17 }
 0x24f   : > { %v358_v18 = vpop.xlane.xlu0 %357 }
 0x250   : > { %v359_v19 = vmul.f32 0.03125, %v358_v18 }
 0x252   : > { %v360_v20 = vadd.f32 1e-12, %v359_v19 }
 0x254   : > { %595 = vrsqrt.f32 %v360_v20 }
 0x261   : > { %v596_v21 = vpop.eup %595 }
 0x262   : > { %v362_v23 = vmul.f32 %v596_v21, %v354_v15 }
 0x264   : > { %v368_v25 = vmul.f32 %v507_v22, %v362_v23 }
 0x266   : > { %v374_v26 = vadd.f32 %v508_v24, %v368_v25 }
 0x268   : > { %375 = vst.msk [vmem:[%s263_s13] sm:$0xff] %vm274_vm1, %v374_v26 }
 0x269   : > { %692 = shalt.err (!%p689_p9)
}
 0x26a   : > { %s693_s7 = scalar_lea.hbm %s388_s20, 128  ;;  %s697_s8 = scalar_lea.hbm %s1001_s4, 256 }
 0x26b   : > { %p694_p1 = scmp.ne.s32.totalorder %s388_s20, %s693_s7  ;;  %p698_p7 = scmp.lt.s32.totalorder %s388_s20, %s1001_s4 }
 0x26c   : > { %p699_p11 = scmp.lt.s32.totalorder %s697_s8, %s693_s7 }
 0x26d   : > { %p695_p4 = pnand %p694_p1, %p1019_p12 }
 0x26e   : > { %p700_p8 = por %p699_p11, %p698_p7 }
 0x26f   : > { %p696_p6 = pneg %p695_p4 }
 0x271   : > { %p701_p3 = pnand %p700_p8, %p696_p6 }
 0x273   : > { %704 = shalt.err (!%p701_p3)
}
 0x274   : > { %537 = dma.vmem_to_hbm [thread:$0]  (%p1019_p12), %s391_s24, 128, %s388_s20, %s377_s25  }
 0x275 PF: > { %s402_s12 = sand.u32 1, %s739_s15   ;;  %p1020_p10 = scmp.ne.s32.totalorder %s1008_s22, 0 }
 0x276   : > { %p1021_p2 = scmp.ge.s32.totalorder %s751_s18, 2  ;;  %s403_s29 = scalar_lea.sflag [#allocation4], %s402_s12 }
 0x278   : > { %p551_p13 = pnand %p1021_p2, %p1020_p10 }
 0x27a   : > { %p552_p0 = pneg %p551_p13 }
 0x27c   : > { %734 = dma.done.wait (%p552_p0), %s403_s29, 128  }
 0x27d   : > { %736 = vsyncadd (%p552_p0), %s403_s29, 4294967168  ;;  %p20_p5 = scmp.ge.s32.totalorder %s840_s27, 4   ;;  %s1022_s15 = smov %s743_s16 }
 0x27e   : > { %s1023_s16 = smov %s747_s17  ;;  %s1024_s17 = smov %s857_s9 }
 0x27f   : > { %s1025_s18 = smov %s840_s27  ;;  %22 = sbr.rel (!%p20_p5) target bundleno = 9 (0x9), region = 98 }
 0x284   :  { %408 = vsyncpa [#allocation3], 1 }
 0x285   :  { %410 = vsyncpa [#allocation3 + $0x1], 1 }
 0x286   :  { %411 = vsyncpa [#allocation6], 1 }
 0x287   :  { %413 = vsyncpa [#allocation6 + $0x1], 1 }
 0x288   :  { %414 = vsyncpa [#allocation4], 1 }
 0x289   :  { %416 = vsyncpa [#allocation4 + $0x1], 1 }

</bundles_post_ra>
